<compile_context>
chip_gen: v6e
topology: v6e:2x2x1
jax: 0.10.0
libtpu: 0.0.40
codegen_flags: <defaults>
</compile_context>

<pallas_src>
import jax
import jax.numpy as jnp
from jax.experimental import pallas as pl
from jax.experimental.pallas import tpu as pltpu


def _bn_scale_shift_kernel(x_ref, scale_ref, shift_ref, o_ref):
    # Per-row (channel) scale/shift broadcast across the lane (spatial) axis.
    x = x_ref[...].astype(jnp.float32)
    o_ref[...] = (x * scale_ref[...] + shift_ref[...]).astype(o_ref.dtype)


def _largest_aligned_divisor(dim, align, cap):
    """Largest t <= cap with t % align == 0 and dim % t == 0; falls back to dim."""
    if dim % align != 0 or dim <= align:
        return dim
    cap = min(dim, max(align, cap))
    t = (cap // align) * align
    while t >= align:
        if dim % t == 0:
            return t
        t -= align
    return dim


def balanced_bn_ema_forward(x_nchw, global_mean, global_var, weight, bias, eps,
                            *, target_block_bytes=1 << 20):
    """y = (x - global_mean) / sqrt(global_var + eps) * weight + bias."""
    N, C, H, W = x_nchw.shape
    rows, cols = N * C, H * W
    x2 = x_nchw.reshape(rows, cols)                      # pure view
    in_dtype = x_nchw.dtype
    itemsize = jnp.dtype(in_dtype).itemsize

    # Per-channel scale/shift, precomputed once (tiny), expanded per row.
    inv = jax.lax.rsqrt(global_var.astype(jnp.float32) + jnp.float32(eps))
    scale_c = weight.astype(jnp.float32) * inv
    shift_c = bias.astype(jnp.float32) - global_mean.astype(jnp.float32) * scale_c
    # row r of x2 corresponds to channel r % C
    scale_r = jnp.tile(scale_c, N).reshape(rows, 1)
    shift_r = jnp.tile(shift_c, N).reshape(rows, 1)

    # ~1 MiB input blocks; legal tile dims (lane mult of 128, sublane mult of 8,
    # or full extent), no padding and no post-kernel slicing needed.
    target_elems = max(8 * 128, target_block_bytes // itemsize)
    col_tile = _largest_aligned_divisor(cols, 128, max(128, target_elems // 8))
    row_tile = _largest_aligned_divisor(rows, 8, max(8, target_elems // col_tile))
    grid = (rows // row_tile, cols // col_tile)

    out = pl.pallas_call(
        _bn_scale_shift_kernel,
        out_shape=jax.ShapeDtypeStruct((rows, cols), in_dtype),
        grid_spec=pltpu.PrefetchScalarGridSpec(
            num_scalar_prefetch=0,
            grid=grid,
            in_specs=[
                pl.BlockSpec((row_tile, col_tile), lambda i, j: (i, j)),
                pl.BlockSpec((row_tile, 1), lambda i, j: (i, 0)),
                pl.BlockSpec((row_tile, 1), lambda i, j: (i, 0)),
            ],
            out_specs=pl.BlockSpec((row_tile, col_tile), lambda i, j: (i, j)),
        ),
        compiler_params=pltpu.CompilerParams(
            dimension_semantics=("parallel", "parallel")),
    )(x2, scale_r, shift_r)

    return out.reshape(N, C, H, W)                       # pure view


class BalancedBNEMA:
    """JAX port of TRIBE's BalancedBNEMA (inference normalization path)."""

    def __init__(self, num_features, num_classes=1, momentum_a=0.1, gamma=0.0,
                 eps=1e-5, key=None):
        self.num_features = num_features
        self.num_classes = num_classes
        self.eps = eps
        self.momentum = momentum_a
        self.gamma = gamma
        if key is None:
            key = jax.random.PRNGKey(0)
        k_w, k_b, k_m, k_v = jax.random.split(key, 4)
        # Deterministic synthetic "checkpoint": affine params + running stats.
        self.weight = jax.random.uniform(k_w, (num_features,), jnp.float32, 0.5, 1.5)
        self.bias = jax.random.normal(k_b, (num_features,), jnp.float32) * 0.1
        self.global_mean = jax.random.normal(k_m, (num_features,), jnp.float32) * 0.1
        self.global_var = jax.random.uniform(k_v, (num_features,), jnp.float32, 0.5, 1.5)
        # Per-class local statistics (expanded copies of the running stats).
        self.local_mean = jnp.broadcast_to(self.global_mean[None, :],
                                           (num_classes, num_features)).copy()
        self.local_var = jnp.broadcast_to(self.global_var[None, :],
                                          (num_classes, num_features)).copy()
        self.label = None

    def forward(self, x):
        # PyTorch forward detaches the buffers; apply stop_gradient locally
        # (no self-mutation -> jit / functional safe).
        g_mean = jax.lax.stop_gradient(self.global_mean)
        g_var = jax.lax.stop_gradient(self.global_var)
        _ = jax.lax.stop_gradient(self.local_mean)
        _ = jax.lax.stop_gradient(self.local_var)
        return balanced_bn_ema_forward(
            x, g_mean, g_var, self.weight, self.bias, self.eps)

    __call__ = forward


if __name__ == "__main__":
    key = jax.random.PRNGKey(0)
    k_x, k_p = jax.random.split(key)
    N, C, H, W = 2, 4, 16, 16
    x = jax.random.normal(k_x, (N, C, H, W), jnp.float32)

    layer = BalancedBNEMA(num_features=C, num_classes=1, key=k_p)
    y = layer(x)
    y = jax.block_until_ready(y)

    # Sanity check against a pure-JAX reference.
    ref = (x - layer.global_mean[None, :, None, None]) / jnp.sqrt(
        layer.global_var[None, :, None, None] + layer.eps)
    ref = ref * layer.weight[None, :, None, None] + layer.bias[None, :, None, None]
    assert y.shape == x.shape and y.dtype == x.dtype
    assert jnp.max(jnp.abs(y.astype(jnp.float32) - ref)) < 1e-4

    print("KERNEL_OK")
</pallas_src>

<mosaic_0001>
module attributes {stable_mosaic.version = 11 : i64} {
  func.func @_bn_scale_shift_kernel(%arg0: i32, %arg1: i32, %arg2: memref<8x256xf32, #tpu.memory_space<vmem>>, %arg3: memref<8x1xf32, #tpu.memory_space<vmem>>, %arg4: memref<8x1xf32, #tpu.memory_space<vmem>>, %arg5: memref<8x256xf32, #tpu.memory_space<vmem>>) attributes {dimension_semantics = [#tpu.dimension_semantics<parallel>, #tpu.dimension_semantics<parallel>], iteration_bounds = array<i64: 1, 1>, scalar_prefetch = 0 : i64, scratch_operands = 0 : i64, tpu.core_type = #tpu.core_type<tc>, window_params = [{transform_indices = @transform_0, window_bounds = array<i64: 8, 256>}, {transform_indices = @transform_1, window_bounds = array<i64: 8, 1>}, {transform_indices = @transform_2, window_bounds = array<i64: 8, 1>}, {transform_indices = @transform_3, window_bounds = array<i64: 8, 256>}]} {
    %c0 = arith.constant 0 : index
    %c0_0 = arith.constant 0 : index
    %0 = vector.load %arg2[%c0, %c0_0] : memref<8x256xf32, #tpu.memory_space<vmem>>, vector<8x256xf32>
    %c0_1 = arith.constant 0 : index
    %c0_2 = arith.constant 0 : index
    %1 = vector.load %arg3[%c0_1, %c0_2] : memref<8x1xf32, #tpu.memory_space<vmem>>, vector<8x1xf32>
    %2 = vector.broadcast %1 : vector<8x1xf32> to vector<8x256xf32>
    %3 = arith.mulf %0, %2 : vector<8x256xf32>
    %c0_3 = arith.constant 0 : index
    %c0_4 = arith.constant 0 : index
    %4 = vector.load %arg4[%c0_3, %c0_4] : memref<8x1xf32, #tpu.memory_space<vmem>>, vector<8x1xf32>
    %5 = vector.broadcast %4 : vector<8x1xf32> to vector<8x256xf32>
    %6 = arith.addf %3, %5 : vector<8x256xf32>
    %c0_5 = arith.constant 0 : index
    %c0_6 = arith.constant 0 : index
    %7 = vector.load %arg5[%c0_5, %c0_6] : memref<8x256xf32, #tpu.memory_space<vmem>>, vector<8x256xf32>
    tpu.vector_store %arg5[%c0_5, %c0_6], %6 {strides = array<i32>} : memref<8x256xf32, #tpu.memory_space<vmem>>, vector<8x256xf32>,
    return
  }
  func.func @transform_0(%arg0: i32, %arg1: i32) -> (i32, i32) {
    %c0_i32 = arith.constant 0 : i32
    return %arg0, %arg1 : i32, i32
  }
  func.func @transform_1(%arg0: i32, %arg1: i32) -> (i32, i32) {
    %c0_i32 = arith.constant 0 : i32
    %c0_i32_0 = arith.constant 0 : i32
    return %arg0, %c0_i32 : i32, i32
  }
  func.func @transform_2(%arg0: i32, %arg1: i32) -> (i32, i32) {
    %c0_i32 = arith.constant 0 : i32
    %c0_i32_0 = arith.constant 0 : i32
    return %arg0, %c0_i32 : i32, i32
  }
  func.func @transform_3(%arg0: i32, %arg1: i32) -> (i32, i32) {
    %c0_i32 = arith.constant 0 : i32
    return %arg0, %arg1 : i32, i32
  }
}

</mosaic_0001>

<bundles_post_ra>
// kernel: tpu_custom_call.1
= control target key start
LH: loop header
LB: loop body
LE: loop exit
PB: predicated region body
PF: predicated region fallthrough
CT: control target
= control target key end

     0   :  { %v74_v1 = vmov 0   ;;  %s111_s0 = inlined_call_operand.vmem [shape: f32[8,256], index: 0, kind: input, shape index: {}]   ;;  %s112_s1 = inlined_call_operand.vmem [shape: f32[8,1], index: 1, kind: input, shape index: {}]   ;;  %s113_s2 = inlined_call_operand.vmem [shape: f32[8,1], index: 2, kind: input, shape index: {}]   ;;  %s114_s3 = inlined_call_operand.hbm [shape: f32[8,256], index: 3, kind: output, shape index: {}]  }
   0x1   :  { %v17_v0 = vld [vmem:[%s112_s1] sm:$0xff]  ;;  %51 = vset.pattern.permute.xlu0 %v74_v1 }
   0x2   :  { %8 = vsyncpa [#allocation3], 0  ;;  %20 = vperm.xlu0 %51, %v17_v0   ;;  %v25_v2 = vld [vmem:[%s113_s2] sm:$0xff]  ;;  %v16_v5 = vld [vmem:[%s111_s0 + $0x8] sm:$0xff]  ;;  %s75_s20 = smov [#allocation2]  }
   0x3   :  { %v15_v4 = vld [vmem:[%s111_s0] sm:$0xff]  ;;  %s41_s1 = sshll.u32 %s75_s20, 4  ;;  %s42_s1 = int_to_ptr.vmem [resolvable:$true] %s41_s1 }
   0x4   :  { %s52_s2 = scalar_lea.vmem %s42_s1, 256  ;;  %p57_p1 = scmp.lt.s32.totalorder %s42_s1, %s42_s1 }
   0x5   :  { %p53_p0 = scmp.ne.s32.totalorder %s42_s1, %s52_s2  ;;  %p58_p2 = scmp.lt.s32.totalorder %s52_s2, %s52_s2 }
   0x6   :  { %28 = vperm.xlu0 %51, %v25_v2  }
   0x7   :  { %p59_p3 = por %p58_p2, %p57_p1 }
   0x9   :  { %p60_p4 = pnand %p59_p3, %p53_p0 }
  0x7d   :  { %v21_v3 = vpop.permute.xlu0 %20 }
  0x7e   :  { %v23_v6 = vmul.f32 %v21_v3, %v15_v4  ;;  %v24_v7 = vmul.f32 %v21_v3, %v16_v5 }
  0x81   :  { %v29_v8 = vpop.permute.xlu0 %28 }
  0x82   :  { %v31_v9 = vadd.f32 %v29_v8, %v23_v6  ;;  %v32_v10 = vadd.f32 %v29_v8, %v24_v7 }
  0x84   :  { %33 = vst [vmem:[#allocation2] sm:$0xff] %v31_v9  ;;  %34 = vst [vmem:[#allocation2 + $0x8] sm:$0xff] %v32_v10 }
  0x85   :  { %63 = shalt.err (!%p60_p4)
}
  0x86   :  { %44 = dma.vmem_to_hbm [thread:$0]  %s42_s1, 256, %s114_s3, [#allocation3]  }
  0x87   :  { %72 = dma.done.wait [#allocation3], 256  }
  0x88   :  { %73 = vsyncadd [#allocation3], 4294967040 }
  0x89   :  { %48 = vsyncpa [#allocation3], 1 }

</bundles_post_ra>
